<compile_context>
chip_gen: v5e
topology: v5e:2x2
jax: 0.10.0
libtpu: 0.0.40
codegen_flags: <defaults>
</compile_context>

<pallas_src>
import jax
import jax.numpy as jnp
from jax.experimental import pallas as pl
from jax.experimental.pallas import tpu as pltpu

INPUT_DIM = 3
REPR_DIM = 32
H1 = 128
H2 = 64
LANE = 128
XPAD = 8                      # K=3 input zero-padded to 8 for one MXU pass
BN_EPS = 1e-5
LRELU_SLOPE = 0.2
MATMUL_DTYPE = jnp.bfloat16   # MXU operand dtype (accumulation stays f32)


def _vmem_budget_bytes():
    """Scoped-VMEM request, derived per TPU generation (fallback: 32 MiB)."""
    try:
        cap = int(pltpu.get_tpu_info().vmem_capacity_bytes)
        # ~75% of physical per-core VMEM, clamped to [32 MiB, 96 MiB]:
        #   v5e/v6e (128 MiB) -> 96 MiB,  v7x (64 MiB) -> 48 MiB.
        return int(min(96 * 2**20, max(32 * 2**20, 0.75 * cap)))
    except Exception:
        return 32 * 2**20


VMEM_BUDGET = _vmem_budget_bytes()

# Whole-batch residence cap: budget ~16 live [*,128]-f32 rows per batch row
# (activations, bf16 operand copies, double-buffered merged output).
MAX_WHOLE_BATCH = max(512, (VMEM_BUDGET // (LANE * 4 * 16)) // 8 * 8)


def _autoencoder_kernel(
    x_ref,                   # [B, 8]   bf16 (x zero-padded to 8 lanes)
    w1, g1, be1,             # enc Linear(3->128) padded to [8,128] + BN(128)
    w2, g2, be2,             # enc Linear(128->64)               + BN(64)
    w3p, b3p,                # enc Linear(64->32) padded to 128 output lanes
    w4p, g4, be4,            # dec Linear(32->64) padded K rows  + BN(64)
    w5, g5, be5,             # dec Linear(64->128)               + BN(128)
    w6p, b6p,                # dec Linear(128->3) -> lanes 32..34 of 128
    out_ref,                 # [B, 128] f32: z in lanes 0..31, xrec in 32..34
):
    inv_b = 1.0 / x_ref.shape[0]

    def bn_lrelu(h, g_ref, be_ref):
        # Training-mode BatchNorm1d, single read pass:
        #   mu = E[h], var = E[h^2] - mu^2  (biased), then one fused affine
        #   h*scale + (beta - mu*scale) with scale = gamma * rsqrt(var + eps).
        mu = jnp.sum(h, axis=0, keepdims=True) * inv_b
        ex2 = jnp.sum(h * h, axis=0, keepdims=True) * inv_b
        var = ex2 - mu * mu
        scale = g_ref[...] * jax.lax.rsqrt(var + BN_EPS)       # EUP rsqrt
        shift = be_ref[...] - mu * scale
        hn = h * scale + shift
        # LeakyReLU(0.2): max(x, 0.2x) — 2 VALU ops, no cmp+select.
        return jnp.maximum(hn, LRELU_SLOPE * hn)

    def mm(a, w_ref):
        # bf16 MXU operands, f32 accumulation.
        return jnp.dot(a.astype(MATMUL_DTYPE), w_ref[...],
                       preferred_element_type=jnp.float32)

    # ----- encoder -----
    x = x_ref[...]                                             # [B, 8] bf16
    h = jnp.dot(x, w1[...], preferred_element_type=jnp.float32)  # [B, 128]
    h = bn_lrelu(h, g1, be1)

    h = mm(h, w2)                                              # [B, 64]
    h = bn_lrelu(h, g2, be2)

    # Bottleneck: lanes 0..31 hold z, lanes 32..127 are exactly zero
    # (padded weight columns and bias are zero).
    z = mm(h, w3p) + b3p[...]                                  # [B, 128]

    # ----- decoder -----
    # w4p has zero rows for the padded z lanes -> result is exact.
    h = mm(z, w4p)                                             # [B, 64]
    h = bn_lrelu(h, g4, be4)

    h = mm(h, w5)                                              # [B, 128]
    h = bn_lrelu(h, g5, be5)

    # xr has non-zero values only in lanes 32..34 (w6/b6 left-padded by 32).
    xr = mm(h, w6p) + b6p[...]                                 # [B, 128]

    # Disjoint non-zero lanes -> exact merge; single lane-dense [B,128] store.
    out_ref[...] = (z + xr).astype(out_ref.dtype)


def _full_spec(shape):
    # Whole-array block, single grid step.
    return pl.BlockSpec(shape, lambda i: tuple(0 for _ in shape))


def prepare_params(params):
    """One-time parameter prep: pad to lane-dense shapes + cast to bf16."""
    (w1, b1, g1, be1,
     w2, b2, g2, be2,
     w3, b3,
     w4, b4, g4, be4,
     w5, b5, g5, be5,
     w6, b6) = params
    del b1, b2, b4, b5   # exactly cancelled by the following BN mean subtraction

    cast = lambda w: w.astype(MATMUL_DTYPE)

    w1p = cast(jnp.pad(w1, ((0, XPAD - INPUT_DIM), (0, 0))))            # [8,128]
    w3p = cast(jnp.pad(w3, ((0, 0), (0, LANE - REPR_DIM))))             # [64,128]
    b3p = jnp.pad(b3, ((0, 0), (0, LANE - REPR_DIM)))                   # [1,128] f32
    w4p = cast(jnp.pad(w4, ((0, LANE - REPR_DIM), (0, 0))))             # [128,64]
    # Left-pad by REPR_DIM so x_reconstructed lands in lanes 32..34 of the
    # merged output tile.
    w6p = cast(jnp.pad(w6, ((0, 0),
                            (REPR_DIM, LANE - REPR_DIM - INPUT_DIM))))  # [128,128]
    b6p = jnp.pad(b6, ((0, 0),
                       (REPR_DIM, LANE - REPR_DIM - INPUT_DIM)))        # [1,128] f32

    return (w1p, g1, be1,
            cast(w2), g2, be2,
            w3p, b3p,
            w4p, g4, be4,
            cast(w5), g5, be5,
            w6p, b6p)


@jax.jit
def autoencoder_forward(x, kparams):
    """x: [B, INPUT_DIM] float32.  kparams: output of prepare_params.

    Returns (x_reconstructed [B, INPUT_DIM], z [B, REPR_DIM]).
    """
    (w1p, g1, be1, w2, g2, be2, w3p, b3p,
     w4p, g4, be4, w5, g5, be5, w6p, b6p) = kparams

    B = x.shape[0]
    assert 2 <= B <= MAX_WHOLE_BATCH, (
        "whole-batch BatchNorm kernel: batch exceeds the VMEM-derived cap; "
        "tile the batch with a two-pass global-stats BN scheme instead")

    # Tiny per-call prep: pad K=3 -> 8 and cast for the first MXU pass.
    x8 = jnp.pad(x, ((0, 0), (0, XPAD - INPUT_DIM))).astype(MATMUL_DTYPE)

    kern_inputs = (
        x8,
        w1p, g1, be1,
        w2, g2, be2,
        w3p, b3p,
        w4p, g4, be4,
        w5, g5, be5,
        w6p, b6p,
    )

    in_specs = [_full_spec(a.shape) for a in kern_inputs]
    out_spec = _full_spec((B, LANE))
    out_shape = jax.ShapeDtypeStruct((B, LANE), jnp.float32)

    # Advisory cost estimate (MXU + VPU flops, EUP rsqrt, HBM bytes).
    matmul_flops = 2 * B * (XPAD * H1 + H1 * H2 + H2 * LANE
                            + LANE * H2 + H2 * H1 + H1 * LANE)
    vpu_flops = 8 * B * (H1 + H2 + H2 + H1) + 2 * B * LANE
    bytes_accessed = (sum(int(a.size) * a.dtype.itemsize for a in kern_inputs)
                      + B * LANE * 4)
    cost = pl.CostEstimate(
        flops=int(matmul_flops + vpu_flops),
        transcendentals=int(H1 + H2 + H2 + H1),
        bytes_accessed=int(bytes_accessed),
    )

    out = pl.pallas_call(
        _autoencoder_kernel,
        out_shape=out_shape,
        grid_spec=pltpu.PrefetchScalarGridSpec(
            num_scalar_prefetch=0,
            grid=(1,),
            in_specs=in_specs,
            out_specs=out_spec,
        ),
        compiler_params=pltpu.CompilerParams(
            dimension_semantics=("arbitrary",),
            vmem_limit_bytes=VMEM_BUDGET,
        ),
        cost_estimate=cost,
    )(*kern_inputs)

    z = out[:, :REPR_DIM]
    x_rec = out[:, REPR_DIM:REPR_DIM + INPUT_DIM]
    return x_rec, z


def init_params(key):
    """Deterministic synthetic parameter init (shapes from the nn.Module)."""
    dims = [
        (INPUT_DIM, H1),   # enc Linear 1
        (H1, H2),          # enc Linear 2
        (H2, REPR_DIM),    # enc Linear 3
        (REPR_DIM, H2),    # dec Linear 1
        (H2, H1),          # dec Linear 2
        (H1, INPUT_DIM),   # dec Linear 3
    ]
    bn_dims = [H1, H2, H2, H1]  # BN after enc L1, enc L2, dec L1, dec L2

    keys = jax.random.split(key, len(dims) * 2 + len(bn_dims) * 2)
    ki = iter(range(len(keys)))

    linears = []
    for (din, dout) in dims:
        w = 0.1 * jax.random.normal(keys[next(ki)], (din, dout), jnp.float32)
        b = 0.05 * jax.random.normal(keys[next(ki)], (1, dout), jnp.float32)
        linears.append((w, b))

    bns = []
    for d in bn_dims:
        g = 1.0 + 0.1 * jax.random.normal(keys[next(ki)], (1, d), jnp.float32)
        be = 0.05 * jax.random.normal(keys[next(ki)], (1, d), jnp.float32)
        bns.append((g, be))

    (w1, b1), (w2, b2), (w3, b3), (w4, b4), (w5, b5), (w6, b6) = linears
    (g1, be1), (g2, be2), (g4, be4), (g5, be5) = bns

    return (
        w1, b1, g1, be1,
        w2, b2, g2, be2,
        w3, b3,
        w4, b4, g4, be4,
        w5, b5, g5, be5,
        w6, b6,
    )


def reference_forward(x, params, matmul_dtype=None):
    """Pure-JAX reference matching the PyTorch module (training-mode BN).

    matmul_dtype=None  -> full f32 matmuls (the PyTorch semantics).
    matmul_dtype=bf16  -> same operand rounding the TPU kernel uses on the MXU.
    """
    (w1, b1, g1, be1, w2, b2, g2, be2, w3, b3,
     w4, b4, g4, be4, w5, b5, g5, be5, w6, b6) = params

    def dot(a, w):
        if matmul_dtype is None:
            return a @ w
        return jnp.dot(a.astype(matmul_dtype), w.astype(matmul_dtype),
                       preferred_element_type=jnp.float32)

    def bn_lrelu(h, g, be):
        mu = h.mean(axis=0, keepdims=True)
        var = ((h - mu) ** 2).mean(axis=0, keepdims=True)
        hn = (h - mu) / jnp.sqrt(var + BN_EPS) * g + be
        return jnp.where(hn >= 0, hn, LRELU_SLOPE * hn)

    h = dot(x, w1) + b1
    h = bn_lrelu(h, g1, be1)
    h = dot(h, w2) + b2
    h = bn_lrelu(h, g2, be2)
    z = dot(h, w3) + b3
    h = dot(z, w4) + b4
    h = bn_lrelu(h, g4, be4)
    h = dot(h, w5) + b5
    h = bn_lrelu(h, g5, be5)
    xr = dot(h, w6) + b6
    return xr, z


if __name__ == "__main__":
    key = jax.random.PRNGKey(0)
    k_param, k_x = jax.random.split(key)

    B = 8  # batch size (BatchNorm1d training mode needs B > 1)
    x = jax.random.normal(k_x, (B, INPUT_DIM), jnp.float32)
    params = init_params(k_param)
    kparams = prepare_params(params)          # one-time pad + bf16 cast

    x_rec, z = autoencoder_forward(x, kparams)
    jax.block_until_ready((x_rec, z))

    assert x_rec.shape == (B, INPUT_DIM) and z.shape == (B, REPR_DIM)
    assert bool(jnp.all(jnp.isfinite(x_rec))) and bool(jnp.all(jnp.isfinite(z)))

    # Structural correctness: reference with the same bf16 MXU operand
    # rounding the kernel uses (tight tolerance).
    xr_ref_bf, z_ref_bf = reference_forward(x, params, matmul_dtype=MATMUL_DTYPE)
    assert bool(jnp.allclose(z, z_ref_bf, rtol=2e-3, atol=2e-3)), "z mismatch"
    assert bool(jnp.allclose(x_rec, xr_ref_bf, rtol=2e-3, atol=2e-3)), "x_rec mismatch"

    # Sanity vs the pure-f32 PyTorch-equivalent reference (difference is only
    # the deliberate bf16 MXU-operand rounding).
    xr_ref, z_ref = reference_forward(x, params, matmul_dtype=None)
    assert bool(jnp.allclose(z, z_ref, rtol=5e-2, atol=5e-2)), "z far from f32 ref"
    assert bool(jnp.allclose(x_rec, xr_ref, rtol=5e-2, atol=5e-2)), "x_rec far from f32 ref"

    print("KERNEL_OK")
</pallas_src>

<mosaic_0001>
module attributes {stable_mosaic.version = 11 : i64} {
  func.func @_autoencoder_kernel(%arg0: i32, %arg1: memref<8x8xbf16, #tpu.memory_space<vmem>>, %arg2: memref<8x128xbf16, #tpu.memory_space<vmem>>, %arg3: memref<1x128xf32, #tpu.memory_space<vmem>>, %arg4: memref<1x128xf32, #tpu.memory_space<vmem>>, %arg5: memref<128x64xbf16, #tpu.memory_space<vmem>>, %arg6: memref<1x64xf32, #tpu.memory_space<vmem>>, %arg7: memref<1x64xf32, #tpu.memory_space<vmem>>, %arg8: memref<64x128xbf16, #tpu.memory_space<vmem>>, %arg9: memref<1x128xf32, #tpu.memory_space<vmem>>, %arg10: memref<128x64xbf16, #tpu.memory_space<vmem>>, %arg11: memref<1x64xf32, #tpu.memory_space<vmem>>, %arg12: memref<1x64xf32, #tpu.memory_space<vmem>>, %arg13: memref<64x128xbf16, #tpu.memory_space<vmem>>, %arg14: memref<1x128xf32, #tpu.memory_space<vmem>>, %arg15: memref<1x128xf32, #tpu.memory_space<vmem>>, %arg16: memref<128x128xbf16, #tpu.memory_space<vmem>>, %arg17: memref<1x128xf32, #tpu.memory_space<vmem>>, %arg18: memref<8x128xf32, #tpu.memory_space<vmem>>) attributes {dimension_semantics = [#tpu.dimension_semantics<arbitrary>], iteration_bounds = array<i64: 1>, scalar_prefetch = 0 : i64, scratch_operands = 0 : i64, tpu.core_type = #tpu.core_type<tc>, window_params = [{pipeline_mode = #tpu.pipeline_mode<synchronous>, transform_indices = @transform_0, window_bounds = array<i64: 8, 8>}, {pipeline_mode = #tpu.pipeline_mode<synchronous>, transform_indices = @transform_1, window_bounds = array<i64: 8, 128>}, {pipeline_mode = #tpu.pipeline_mode<synchronous>, transform_indices = @transform_2, window_bounds = array<i64: 1, 128>}, {pipeline_mode = #tpu.pipeline_mode<synchronous>, transform_indices = @transform_3, window_bounds = array<i64: 1, 128>}, {pipeline_mode = #tpu.pipeline_mode<synchronous>, transform_indices = @transform_4, window_bounds = array<i64: 128, 64>}, {pipeline_mode = #tpu.pipeline_mode<synchronous>, transform_indices = @transform_5, window_bounds = array<i64: 1, 64>}, {pipeline_mode = #tpu.pipeline_mode<synchronous>, transform_indices = @transform_6, window_bounds = array<i64: 1, 64>}, {pipeline_mode = #tpu.pipeline_mode<synchronous>, transform_indices = @transform_7, window_bounds = array<i64: 64, 128>}, {pipeline_mode = #tpu.pipeline_mode<synchronous>, transform_indices = @transform_8, window_bounds = array<i64: 1, 128>}, {pipeline_mode = #tpu.pipeline_mode<synchronous>, transform_indices = @transform_9, window_bounds = array<i64: 128, 64>}, {pipeline_mode = #tpu.pipeline_mode<synchronous>, transform_indices = @transform_10, window_bounds = array<i64: 1, 64>}, {pipeline_mode = #tpu.pipeline_mode<synchronous>, transform_indices = @transform_11, window_bounds = array<i64: 1, 64>}, {pipeline_mode = #tpu.pipeline_mode<synchronous>, transform_indices = @transform_12, window_bounds = array<i64: 64, 128>}, {pipeline_mode = #tpu.pipeline_mode<synchronous>, transform_indices = @transform_13, window_bounds = array<i64: 1, 128>}, {pipeline_mode = #tpu.pipeline_mode<synchronous>, transform_indices = @transform_14, window_bounds = array<i64: 1, 128>}, {pipeline_mode = #tpu.pipeline_mode<synchronous>, transform_indices = @transform_15, window_bounds = array<i64: 128, 128>}, {pipeline_mode = #tpu.pipeline_mode<synchronous>, transform_indices = @transform_16, window_bounds = array<i64: 1, 128>}, {pipeline_mode = #tpu.pipeline_mode<synchronous>, transform_indices = @transform_17, window_bounds = array<i64: 8, 128>}]} {
    %c0 = arith.constant 0 : index
    %c0_0 = arith.constant 0 : index
    %0 = vector.load %arg1[%c0, %c0_0] : memref<8x8xbf16, #tpu.memory_space<vmem>>, vector<8x8xbf16>
    %c0_1 = arith.constant 0 : index
    %c0_2 = arith.constant 0 : index
    %1 = vector.load %arg2[%c0_1, %c0_2] : memref<8x128xbf16, #tpu.memory_space<vmem>>, vector<8x128xbf16>
    %cst = arith.constant dense<0.000000e+00> : vector<8x128xf32>
    %2 = tpu.matmul %0, %1, %cst {dimension_numbers = #tpu.dot_dimension_numbers<[1], [0], [0], [1], [0, 0, 1, 1], [], []>} : vector<8x8xbf16>, vector<8x128xbf16>, vector<8x128xf32> -> vector<8x128xf32>
    %cst_3 = arith.constant dense<0.000000e+00> : vector<128xf32>
    %3 = vector.multi_reduction <add>, %2, %cst_3 [0] : vector<8x128xf32> to vector<128xf32>
    %4 = vector.shape_cast %3 : vector<128xf32> to vector<1x128xf32>
    %cst_4 = arith.constant 1.250000e-01 : f32
    %5 = vector.broadcast %cst_4 : f32 to vector<1x128xf32>
    %6 = arith.mulf %4, %5 : vector<1x128xf32>
    %7 = arith.mulf %2, %2 : vector<8x128xf32>
    %cst_5 = arith.constant dense<0.000000e+00> : vector<128xf32>
    %8 = vector.multi_reduction <add>, %7, %cst_5 [0] : vector<8x128xf32> to vector<128xf32>
    %9 = vector.shape_cast %8 : vector<128xf32> to vector<1x128xf32>
    %cst_6 = arith.constant 1.250000e-01 : f32
    %10 = vector.broadcast %cst_6 : f32 to vector<1x128xf32>
    %11 = arith.mulf %9, %10 : vector<1x128xf32>
    %12 = arith.mulf %6, %6 : vector<1x128xf32>
    %13 = arith.subf %11, %12 : vector<1x128xf32>
    %c0_7 = arith.constant 0 : index
    %c0_8 = arith.constant 0 : index
    %14 = vector.load %arg3[%c0_7, %c0_8] : memref<1x128xf32, #tpu.memory_space<vmem>>, vector<1x128xf32>
    %cst_9 = arith.constant 9.99999974E-6 : f32
    %15 = vector.broadcast %cst_9 : f32 to vector<1x128xf32>
    %16 = arith.addf %13, %15 : vector<1x128xf32>
    %17 = math.rsqrt %16 : vector<1x128xf32>
    %18 = arith.mulf %14, %17 : vector<1x128xf32>
    %c0_10 = arith.constant 0 : index
    %c0_11 = arith.constant 0 : index
    %19 = vector.load %arg4[%c0_10, %c0_11] : memref<1x128xf32, #tpu.memory_space<vmem>>, vector<1x128xf32>
    %20 = arith.mulf %6, %18 : vector<1x128xf32>
    %21 = arith.subf %19, %20 : vector<1x128xf32>
    %22 = vector.broadcast %18 : vector<1x128xf32> to vector<8x128xf32>
    %23 = arith.mulf %2, %22 : vector<8x128xf32>
    %24 = vector.broadcast %21 : vector<1x128xf32> to vector<8x128xf32>
    %25 = arith.addf %23, %24 : vector<8x128xf32>
    %cst_12 = arith.constant 2.000000e-01 : f32
    %26 = vector.broadcast %cst_12 : f32 to vector<8x128xf32>
    %27 = arith.mulf %26, %25 : vector<8x128xf32>
    %28 = arith.maximumf %25, %27 : vector<8x128xf32>
    %29 = arith.truncf %28 : vector<8x128xf32> to vector<8x128xbf16>
    %c0_13 = arith.constant 0 : index
    %c0_14 = arith.constant 0 : index
    %30 = vector.load %arg5[%c0_13, %c0_14] : memref<128x64xbf16, #tpu.memory_space<vmem>>, vector<128x64xbf16>
    %cst_15 = arith.constant dense<0.000000e+00> : vector<8x64xf32>
    %31 = tpu.matmul %29, %30, %cst_15 {dimension_numbers = #tpu.dot_dimension_numbers<[1], [0], [0], [1], [0, 0, 1, 1], [], []>} : vector<8x128xbf16>, vector<128x64xbf16>, vector<8x64xf32> -> vector<8x64xf32>
    %cst_16 = arith.constant dense<0.000000e+00> : vector<64xf32>
    %32 = vector.multi_reduction <add>, %31, %cst_16 [0] : vector<8x64xf32> to vector<64xf32>
    %33 = vector.shape_cast %32 : vector<64xf32> to vector<1x64xf32>
    %cst_17 = arith.constant 1.250000e-01 : f32
    %34 = vector.broadcast %cst_17 : f32 to vector<1x64xf32>
    %35 = arith.mulf %33, %34 : vector<1x64xf32>
    %36 = arith.mulf %31, %31 : vector<8x64xf32>
    %cst_18 = arith.constant dense<0.000000e+00> : vector<64xf32>
    %37 = vector.multi_reduction <add>, %36, %cst_18 [0] : vector<8x64xf32> to vector<64xf32>
    %38 = vector.shape_cast %37 : vector<64xf32> to vector<1x64xf32>
    %cst_19 = arith.constant 1.250000e-01 : f32
    %39 = vector.broadcast %cst_19 : f32 to vector<1x64xf32>
    %40 = arith.mulf %38, %39 : vector<1x64xf32>
    %41 = arith.mulf %35, %35 : vector<1x64xf32>
    %42 = arith.subf %40, %41 : vector<1x64xf32>
    %c0_20 = arith.constant 0 : index
    %c0_21 = arith.constant 0 : index
    %43 = vector.load %arg6[%c0_20, %c0_21] : memref<1x64xf32, #tpu.memory_space<vmem>>, vector<1x64xf32>
    %cst_22 = arith.constant 9.99999974E-6 : f32
    %44 = vector.broadcast %cst_22 : f32 to vector<1x64xf32>
    %45 = arith.addf %42, %44 : vector<1x64xf32>
    %46 = math.rsqrt %45 : vector<1x64xf32>
    %47 = arith.mulf %43, %46 : vector<1x64xf32>
    %c0_23 = arith.constant 0 : index
    %c0_24 = arith.constant 0 : index
    %48 = vector.load %arg7[%c0_23, %c0_24] : memref<1x64xf32, #tpu.memory_space<vmem>>, vector<1x64xf32>
    %49 = arith.mulf %35, %47 : vector<1x64xf32>
    %50 = arith.subf %48, %49 : vector<1x64xf32>
    %51 = vector.broadcast %47 : vector<1x64xf32> to vector<8x64xf32>
    %52 = arith.mulf %31, %51 : vector<8x64xf32>
    %53 = vector.broadcast %50 : vector<1x64xf32> to vector<8x64xf32>
    %54 = arith.addf %52, %53 : vector<8x64xf32>
    %cst_25 = arith.constant 2.000000e-01 : f32
    %55 = vector.broadcast %cst_25 : f32 to vector<8x64xf32>
    %56 = arith.mulf %55, %54 : vector<8x64xf32>
    %57 = arith.maximumf %54, %56 : vector<8x64xf32>
    %58 = arith.truncf %57 : vector<8x64xf32> to vector<8x64xbf16>
    %c0_26 = arith.constant 0 : index
    %c0_27 = arith.constant 0 : index
    %59 = vector.load %arg8[%c0_26, %c0_27] : memref<64x128xbf16, #tpu.memory_space<vmem>>, vector<64x128xbf16>
    %cst_28 = arith.constant dense<0.000000e+00> : vector<8x128xf32>
    %60 = tpu.matmul %58, %59, %cst_28 {dimension_numbers = #tpu.dot_dimension_numbers<[1], [0], [0], [1], [0, 0, 1, 1], [], []>} : vector<8x64xbf16>, vector<64x128xbf16>, vector<8x128xf32> -> vector<8x128xf32>
    %c0_29 = arith.constant 0 : index
    %c0_30 = arith.constant 0 : index
    %61 = vector.load %arg9[%c0_29, %c0_30] : memref<1x128xf32, #tpu.memory_space<vmem>>, vector<1x128xf32>
    %62 = vector.broadcast %61 : vector<1x128xf32> to vector<8x128xf32>
    %63 = arith.addf %60, %62 : vector<8x128xf32>
    %64 = arith.truncf %63 : vector<8x128xf32> to vector<8x128xbf16>
    %c0_31 = arith.constant 0 : index
    %c0_32 = arith.constant 0 : index
    %65 = vector.load %arg10[%c0_31, %c0_32] : memref<128x64xbf16, #tpu.memory_space<vmem>>, vector<128x64xbf16>
    %cst_33 = arith.constant dense<0.000000e+00> : vector<8x64xf32>
    %66 = tpu.matmul %64, %65, %cst_33 {dimension_numbers = #tpu.dot_dimension_numbers<[1], [0], [0], [1], [0, 0, 1, 1], [], []>} : vector<8x128xbf16>, vector<128x64xbf16>, vector<8x64xf32> -> vector<8x64xf32>
    %cst_34 = arith.constant dense<0.000000e+00> : vector<64xf32>
    %67 = vector.multi_reduction <add>, %66, %cst_34 [0] : vector<8x64xf32> to vector<64xf32>
    %68 = vector.shape_cast %67 : vector<64xf32> to vector<1x64xf32>
    %cst_35 = arith.constant 1.250000e-01 : f32
    %69 = vector.broadcast %cst_35 : f32 to vector<1x64xf32>
    %70 = arith.mulf %68, %69 : vector<1x64xf32>
    %71 = arith.mulf %66, %66 : vector<8x64xf32>
    %cst_36 = arith.constant dense<0.000000e+00> : vector<64xf32>
    %72 = vector.multi_reduction <add>, %71, %cst_36 [0] : vector<8x64xf32> to vector<64xf32>
    %73 = vector.shape_cast %72 : vector<64xf32> to vector<1x64xf32>
    %cst_37 = arith.constant 1.250000e-01 : f32
    %74 = vector.broadcast %cst_37 : f32 to vector<1x64xf32>
    %75 = arith.mulf %73, %74 : vector<1x64xf32>
    %76 = arith.mulf %70, %70 : vector<1x64xf32>
    %77 = arith.subf %75, %76 : vector<1x64xf32>
    %c0_38 = arith.constant 0 : index
    %c0_39 = arith.constant 0 : index
    %78 = vector.load %arg11[%c0_38, %c0_39] : memref<1x64xf32, #tpu.memory_space<vmem>>, vector<1x64xf32>
    %cst_40 = arith.constant 9.99999974E-6 : f32
    %79 = vector.broadcast %cst_40 : f32 to vector<1x64xf32>
    %80 = arith.addf %77, %79 : vector<1x64xf32>
    %81 = math.rsqrt %80 : vector<1x64xf32>
    %82 = arith.mulf %78, %81 : vector<1x64xf32>
    %c0_41 = arith.constant 0 : index
    %c0_42 = arith.constant 0 : index
    %83 = vector.load %arg12[%c0_41, %c0_42] : memref<1x64xf32, #tpu.memory_space<vmem>>, vector<1x64xf32>
    %84 = arith.mulf %70, %82 : vector<1x64xf32>
    %85 = arith.subf %83, %84 : vector<1x64xf32>
    %86 = vector.broadcast %82 : vector<1x64xf32> to vector<8x64xf32>
    %87 = arith.mulf %66, %86 : vector<8x64xf32>
    %88 = vector.broadcast %85 : vector<1x64xf32> to vector<8x64xf32>
    %89 = arith.addf %87, %88 : vector<8x64xf32>
    %cst_43 = arith.constant 2.000000e-01 : f32
    %90 = vector.broadcast %cst_43 : f32 to vector<8x64xf32>
    %91 = arith.mulf %90, %89 : vector<8x64xf32>
    %92 = arith.maximumf %89, %91 : vector<8x64xf32>
    %93 = arith.truncf %92 : vector<8x64xf32> to vector<8x64xbf16>
    %c0_44 = arith.constant 0 : index
    %c0_45 = arith.constant 0 : index
    %94 = vector.load %arg13[%c0_44, %c0_45] : memref<64x128xbf16, #tpu.memory_space<vmem>>, vector<64x128xbf16>
    %cst_46 = arith.constant dense<0.000000e+00> : vector<8x128xf32>
    %95 = tpu.matmul %93, %94, %cst_46 {dimension_numbers = #tpu.dot_dimension_numbers<[1], [0], [0], [1], [0, 0, 1, 1], [], []>} : vector<8x64xbf16>, vector<64x128xbf16>, vector<8x128xf32> -> vector<8x128xf32>
    %cst_47 = arith.constant dense<0.000000e+00> : vector<128xf32>
    %96 = vector.multi_reduction <add>, %95, %cst_47 [0] : vector<8x128xf32> to vector<128xf32>
    %97 = vector.shape_cast %96 : vector<128xf32> to vector<1x128xf32>
    %cst_48 = arith.constant 1.250000e-01 : f32
    %98 = vector.broadcast %cst_48 : f32 to vector<1x128xf32>
    %99 = arith.mulf %97, %98 : vector<1x128xf32>
    %100 = arith.mulf %95, %95 : vector<8x128xf32>
    %cst_49 = arith.constant dense<0.000000e+00> : vector<128xf32>
    %101 = vector.multi_reduction <add>, %100, %cst_49 [0] : vector<8x128xf32> to vector<128xf32>
    %102 = vector.shape_cast %101 : vector<128xf32> to vector<1x128xf32>
    %cst_50 = arith.constant 1.250000e-01 : f32
    %103 = vector.broadcast %cst_50 : f32 to vector<1x128xf32>
    %104 = arith.mulf %102, %103 : vector<1x128xf32>
    %105 = arith.mulf %99, %99 : vector<1x128xf32>
    %106 = arith.subf %104, %105 : vector<1x128xf32>
    %c0_51 = arith.constant 0 : index
    %c0_52 = arith.constant 0 : index
    %107 = vector.load %arg14[%c0_51, %c0_52] : memref<1x128xf32, #tpu.memory_space<vmem>>, vector<1x128xf32>
    %cst_53 = arith.constant 9.99999974E-6 : f32
    %108 = vector.broadcast %cst_53 : f32 to vector<1x128xf32>
    %109 = arith.addf %106, %108 : vector<1x128xf32>
    %110 = math.rsqrt %109 : vector<1x128xf32>
    %111 = arith.mulf %107, %110 : vector<1x128xf32>
    %c0_54 = arith.constant 0 : index
    %c0_55 = arith.constant 0 : index
    %112 = vector.load %arg15[%c0_54, %c0_55] : memref<1x128xf32, #tpu.memory_space<vmem>>, vector<1x128xf32>
    %113 = arith.mulf %99, %111 : vector<1x128xf32>
    %114 = arith.subf %112, %113 : vector<1x128xf32>
    %115 = vector.broadcast %111 : vector<1x128xf32> to vector<8x128xf32>
    %116 = arith.mulf %95, %115 : vector<8x128xf32>
    %117 = vector.broadcast %114 : vector<1x128xf32> to vector<8x128xf32>
    %118 = arith.addf %116, %117 : vector<8x128xf32>
    %cst_56 = arith.constant 2.000000e-01 : f32
    %119 = vector.broadcast %cst_56 : f32 to vector<8x128xf32>
    %120 = arith.mulf %119, %118 : vector<8x128xf32>
    %121 = arith.maximumf %118, %120 : vector<8x128xf32>
    %122 = arith.truncf %121 : vector<8x128xf32> to vector<8x128xbf16>
    %c0_57 = arith.constant 0 : index
    %c0_58 = arith.constant 0 : index
    %123 = vector.load %arg16[%c0_57, %c0_58] : memref<128x128xbf16, #tpu.memory_space<vmem>>, vector<128x128xbf16>
    %cst_59 = arith.constant dense<0.000000e+00> : vector<8x128xf32>
    %124 = tpu.matmul %122, %123, %cst_59 {dimension_numbers = #tpu.dot_dimension_numbers<[1], [0], [0], [1], [0, 0, 1, 1], [], []>} : vector<8x128xbf16>, vector<128x128xbf16>, vector<8x128xf32> -> vector<8x128xf32>
    %c0_60 = arith.constant 0 : index
    %c0_61 = arith.constant 0 : index
    %125 = vector.load %arg17[%c0_60, %c0_61] : memref<1x128xf32, #tpu.memory_space<vmem>>, vector<1x128xf32>
    %126 = vector.broadcast %125 : vector<1x128xf32> to vector<8x128xf32>
    %127 = arith.addf %124, %126 : vector<8x128xf32>
    %128 = arith.addf %63, %127 : vector<8x128xf32>
    %c0_62 = arith.constant 0 : index
    %c0_63 = arith.constant 0 : index
    %129 = vector.load %arg18[%c0_62, %c0_63] : memref<8x128xf32, #tpu.memory_space<vmem>>, vector<8x128xf32>
    tpu.vector_store %arg18[%c0_62, %c0_63], %128 {strides = array<i32>} : memref<8x128xf32, #tpu.memory_space<vmem>>, vector<8x128xf32>,
    return
  }
  func.func @transform_0(%arg0: i32) -> (i32, i32) {
    %c0_i32 = arith.constant 0 : i32
    %c0_i32_0 = arith.constant 0 : i32
    %c0_i32_1 = arith.constant 0 : i32
    return %c0_i32, %c0_i32_0 : i32, i32
  }
  func.func @transform_1(%arg0: i32) -> (i32, i32) {
    %c0_i32 = arith.constant 0 : i32
    %c0_i32_0 = arith.constant 0 : i32
    %c0_i32_1 = arith.constant 0 : i32
    return %c0_i32, %c0_i32_0 : i32, i32
  }
  func.func @transform_2(%arg0: i32) -> (i32, i32) {
    %c0_i32 = arith.constant 0 : i32
    %c0_i32_0 = arith.constant 0 : i32
    %c0_i32_1 = arith.constant 0 : i32
    return %c0_i32, %c0_i32_0 : i32, i32
  }
  func.func @transform_3(%arg0: i32) -> (i32, i32) {
    %c0_i32 = arith.constant 0 : i32
    %c0_i32_0 = arith.constant 0 : i32
    %c0_i32_1 = arith.constant 0 : i32
    return %c0_i32, %c0_i32_0 : i32, i32
  }
  func.func @transform_4(%arg0: i32) -> (i32, i32) {
    %c0_i32 = arith.constant 0 : i32
    %c0_i32_0 = arith.constant 0 : i32
    %c0_i32_1 = arith.constant 0 : i32
    return %c0_i32, %c0_i32_0 : i32, i32
  }
  func.func @transform_5(%arg0: i32) -> (i32, i32) {
    %c0_i32 = arith.constant 0 : i32
    %c0_i32_0 = arith.constant 0 : i32
    %c0_i32_1 = arith.constant 0 : i32
    return %c0_i32, %c0_i32_0 : i32, i32
  }
  func.func @transform_6(%arg0: i32) -> (i32, i32) {
    %c0_i32 = arith.constant 0 : i32
    %c0_i32_0 = arith.constant 0 : i32
    %c0_i32_1 = arith.constant 0 : i32
    return %c0_i32, %c0_i32_0 : i32, i32
  }
  func.func @transform_7(%arg0: i32) -> (i32, i32) {
    %c0_i32 = arith.constant 0 : i32
    %c0_i32_0 = arith.constant 0 : i32
    %c0_i32_1 = arith.constant 0 : i32
    return %c0_i32, %c0_i32_0 : i32, i32
  }
  func.func @transform_8(%arg0: i32) -> (i32, i32) {
    %c0_i32 = arith.constant 0 : i32
    %c0_i32_0 = arith.constant 0 : i32
    %c0_i32_1 = arith.constant 0 : i32
    return %c0_i32, %c0_i32_0 : i32, i32
  }
  func.func @transform_9(%arg0: i32) -> (i32, i32) {
    %c0_i32 = arith.constant 0 : i32
    %c0_i32_0 = arith.constant 0 : i32
    %c0_i32_1 = arith.constant 0 : i32
    return %c0_i32, %c0_i32_0 : i32, i32
  }
  func.func @transform_10(%arg0: i32) -> (i32, i32) {
    %c0_i32 = arith.constant 0 : i32
    %c0_i32_0 = arith.constant 0 : i32
    %c0_i32_1 = arith.constant 0 : i32
    return %c0_i32, %c0_i32_0 : i32, i32
  }
  func.func @transform_11(%arg0: i32) -> (i32, i32) {
    %c0_i32 = arith.constant 0 : i32
    %c0_i32_0 = arith.constant 0 : i32
    %c0_i32_1 = arith.constant 0 : i32
    return %c0_i32, %c0_i32_0 : i32, i32
  }
  func.func @transform_12(%arg0: i32) -> (i32, i32) {
    %c0_i32 = arith.constant 0 : i32
    %c0_i32_0 = arith.constant 0 : i32
    %c0_i32_1 = arith.constant 0 : i32
    return %c0_i32, %c0_i32_0 : i32, i32
  }
  func.func @transform_13(%arg0: i32) -> (i32, i32) {
    %c0_i32 = arith.constant 0 : i32
    %c0_i32_0 = arith.constant 0 : i32
    %c0_i32_1 = arith.constant 0 : i32
    return %c0_i32, %c0_i32_0 : i32, i32
  }
  func.func @transform_14(%arg0: i32) -> (i32, i32) {
    %c0_i32 = arith.constant 0 : i32
    %c0_i32_0 = arith.constant 0 : i32
    %c0_i32_1 = arith.constant 0 : i32
    return %c0_i32, %c0_i32_0 : i32, i32
  }
  func.func @transform_15(%arg0: i32) -> (i32, i32) {
    %c0_i32 = arith.constant 0 : i32
    %c0_i32_0 = arith.constant 0 : i32
    %c0_i32_1 = arith.constant 0 : i32
    return %c0_i32, %c0_i32_0 : i32, i32
  }
  func.func @transform_16(%arg0: i32) -> (i32, i32) {
    %c0_i32 = arith.constant 0 : i32
    %c0_i32_0 = arith.constant 0 : i32
    %c0_i32_1 = arith.constant 0 : i32
    return %c0_i32, %c0_i32_0 : i32, i32
  }
  func.func @transform_17(%arg0: i32) -> (i32, i32) {
    %c0_i32 = arith.constant 0 : i32
    %c0_i32_0 = arith.constant 0 : i32
    %c0_i32_1 = arith.constant 0 : i32
    return %c0_i32, %c0_i32_0 : i32, i32
  }
}

</mosaic_0001>

<bundles_post_ra>
// kernel: autoencoder_forward.1
= control target key start
LH: loop header
LB: loop body
LE: loop exit
PB: predicated region body
PF: predicated region fallthrough
CT: control target
= control target key end

     0   :  { %vm63_vm0 = vcmask 1043456   ;;  %vm59_vm1 = vcmask 64512   ;;  %vm201_vm5 = vcmask 523264   ;;  %s1012_s1 = inlined_call_operand.vmem [shape: bf16[8,128], index: 1, kind: input, shape index: {}]   ;;  %s1013_s0 = inlined_call_operand.vmem [shape: bf16[8,8], index: 0, kind: input, shape index: {}]   ;;  %s1014_s4 = inlined_call_operand.vmem [shape: bf16[128,64], index: 4, kind: input, shape index: {}]   ;;  %s1015_s2 = inlined_call_operand.vmem [shape: f32[1,128], index: 2, kind: input, shape index: {}]   ;;  %s1016_s3 = inlined_call_operand.vmem [shape: f32[1,128], index: 3, kind: input, shape index: {}]   ;;  %s1017_s8 = inlined_call_operand.vmem [shape: f32[1,128], index: 8, kind: input, shape index: {}]   ;;  %s1018_s7 = inlined_call_operand.vmem [shape: bf16[64,128], index: 7, kind: input, shape index: {}]   ;;  %s1019_s9 = inlined_call_operand.vmem [shape: bf16[128,64], index: 9, kind: input, shape index: {}]   ;;  %s1020_s5 = inlined_call_operand.vmem [shape: f32[1,64], index: 5, kind: input, shape index: {}]   ;;  %s1021_s6 = inlined_call_operand.vmem [shape: f32[1,64], index: 6, kind: input, shape index: {}]   ;;  %s1022_s12 = inlined_call_operand.vmem [shape: bf16[64,128], index: 12, kind: input, shape index: {}]   ;;  %s1023_s10 = inlined_call_operand.vmem [shape: f32[1,64], index: 10, kind: input, shape index: {}]   ;;  %s1024_s11 = inlined_call_operand.vmem [shape: f32[1,64], index: 11, kind: input, shape index: {}]   ;;  %s1025_s16 = inlined_call_operand.vmem [shape: f32[1,128], index: 16, kind: input, shape index: {}]   ;;  %s1026_s15 = inlined_call_operand.vmem [shape: bf16[128,128], index: 15, kind: input, shape index: {}]   ;;  %s1027_s13 = inlined_call_operand.vmem [shape: f32[1,128], index: 13, kind: input, shape index: {}]   ;;  %s1028_s14 = inlined_call_operand.vmem [shape: f32[1,128], index: 14, kind: input, shape index: {}]   ;;  %s1029_s17 = inlined_call_operand.vmem [shape: f32[8,128], index: 17, kind: output, shape index: {}]  }
   0x1   :  { %1030 = sst [smem:[#allocation2_spill]] %s1012_s1  ;;  %v741_v3 = vld [vmem:[%s1014_s4 + $0x38] sm:$0xff]  ;;  %v740_v4 = vld [vmem:[%s1014_s4 + $0x30] sm:$0xff]  ;;  %v739_v5 = vld [vmem:[%s1014_s4 + $0x28] sm:$0xff] }
   0x2   :  { %1031 = sst [smem:[#allocation3_spill]] %s1013_s0  ;;  %188 = vmatpush.bf16.msra.mxu1 %v741_v3  ;;  %v738_v9 = vld [vmem:[%s1014_s4 + $0x20] sm:$0xff]  ;;  %v737_v14 = vld [vmem:[%s1014_s4 + $0x18] sm:$0xff]  ;;  %v736_v20 = vld [vmem:[%s1014_s4 + $0x10] sm:$0xff] }
   0x3   :  { %s1032_s26 = sld [smem:[#allocation2_spill]]  ;;  %v735_v23 = vld [vmem:[%s1014_s4 + $0x8] sm:$0xff]  ;;  %v734_v28 = vld [vmem:[%s1014_s4] sm:$0xff]  ;;  %v745_v59 = vld [vmem:[%s1018_s7 + $0x18] sm:$0xff] }
   0x4   :  { %s1033_s29 = sld [smem:[#allocation3_spill]]  ;;  %v97_v36 = vld [vmem:[%s1015_s2] sm:$0x1] }
   0x5   :  { %v110_v40 = vld [vmem:[%s1016_s3] sm:$0x1] }
   0x6   :  { %189 = vmatpush.bf16.msra.mxu1 %v740_v4 }
   0x9   :  { %v58_v0 = vld [vmem:[%s1032_s26] sm:$0xf] }
   0xa   :  { %v65_v1 = vsel %vm63_vm0, %v58_v0, 0  ;;  %v57_v2 = vld [vmem:[%s1033_s29] sm:$0xf]  ;;  %190 = vmatpush.bf16.msra.mxu1 %v739_v5 }
   0xb   :  { %74 = vmatpush.bf16.msra.mxu0 %v65_v1  ;;  %v744_v1 = vld [vmem:[%s1018_s7 + $0x10] sm:$0xff] }
   0xe   :  { %603 = vmatmul.msk.bf16.vlgmr.msra.gmra.mxu0 %vm59_vm1, %v57_v2  ;;  %191 = vmatpush.bf16.msra.mxu1 %v738_v9 }
   0xf   :  { %291 = vmatpush.bf16.msrb.mxu0 %v745_v59  ;;  %v756_v59 = vld [vmem:[%s1022_s12 + $0x10] sm:$0xff] }
  0x12   :  { %192 = vmatpush.bf16.msra.mxu1 %v737_v14 }
  0x13   :  { %292 = vmatpush.bf16.msrb.mxu0 %v744_v1 }
  0x16   :  { %193 = vmatpush.bf16.msra.mxu1 %v736_v20 }
  0x1a   :  { %194 = vmatpush.bf16.msra.mxu1 %v735_v23  ;;  %v749_v23 = vld [vmem:[%s1019_s9 + $0x18] sm:$0xff] }
  0x1e   :  { %195 = vmatpush.bf16.msra.mxu1 %v734_v28 }
  0x8b   :  { %v76_v6 = vpop.f32.mrf.mxu0 }
  0x8c   :  { %v80_v7 = vrot.slane %v76_v6, 4  ;;  %v87_v8 = vmul.f32 %v76_v6, %v76_v6 }
  0x8e   :  { %v81_v10 = vadd.f32 %v80_v7, %v76_v6  ;;  %v88_v11 = vrot.slane %v87_v8, 4 }
  0x90   :  { %v82_v12 = vrot.slane %v81_v10, 2  ;;  %v89_v13 = vadd.f32 %v88_v11, %v87_v8 }
  0x92   :  { %v83_v15 = vadd.f32 %v82_v12, %v81_v10  ;;  %v90_v16 = vrot.slane %v89_v13, 2  ;;  %v742_v10 = vld [vmem:[%s1018_s7] sm:$0xff]  ;;  %v753_v12 = vld [vmem:[%s1019_s9 + $0x38] sm:$0xff] }
  0x93   :  { %v78_v17 = vpop.f32.mrf.mxu0  ;;  %365 = vmatpush.bf16.msra.mxu3 %v753_v12 }
  0x94   :  { %v84_v18 = vrot.slane %v83_v15, 1  ;;  %v91_v19 = vadd.f32 %v90_v16, %v89_v13  ;;  %v752_v13 = vld [vmem:[%s1019_s9 + $0x30] sm:$0xff]  ;;  %v751_v16 = vld [vmem:[%s1019_s9 + $0x28] sm:$0xff] }
  0x96   :  { %v85_v21 = vadd.f32 %v84_v18, %v83_v15  ;;  %v92_v22 = vrot.slane %v91_v19, 1 }
  0x97   :  { %366 = vmatpush.bf16.msra.mxu3 %v752_v13 }
  0x98   :  { %v86_v24 = vmul.f32 0.125, %v85_v21  ;;  %v93_v25 = vadd.f32 %v92_v22, %v91_v19  ;;  %v750_v19 = vld [vmem:[%s1019_s9 + $0x20] sm:$0xff] }
  0x99   :  { %v221_v21 = vld [vmem:[%s1020_s5] sm:$0x1] }
  0x9a   :  { %v94_v26 = vmul.f32 0.125, %v93_v25  ;;  %v95_v27 = vmul.f32 %v86_v24, %v86_v24 }
  0x9b   :  { %367 = vmatpush.bf16.msra.mxu3 %v751_v16 }
  0x9c   :  { %v96_v29 = vsub.f32 %v94_v26, %v95_v27  ;;  %v234_v26 = vld [vmem:[%s1021_s6] sm:$0x1] }
  0x9e   :  { %v98_v30 = vadd.f32 1e-05, %v96_v29  ;;  %v748_v29 = vld [vmem:[%s1019_s9 + $0x10] sm:$0xff] }
  0x9f   :  { %368 = vmatpush.bf16.msra.mxu3 %v750_v19 }
  0xa0   :  { %768 = vrsqrt.f32 %v98_v30  ;;  %vm105_vm3 = vweird.f32 %v98_v30 }
  0xa3   :  { %369 = vmatpush.bf16.msra.mxu3 %v749_v23 }
  0xa6   :  { %v769_v31 = vpop.eup %768 }
  0xa7   :  { %v100_v32 = vmul.f32 %v769_v31, %v98_v30  ;;  %vm106_vm2 = vweird.f32 %v769_v31  ;;  %370 = vmatpush.bf16.msra.mxu3 %v748_v29 }
  0xa8   :  { %vm107_vm4 = vmor %vm105_vm3, %vm106_vm2 }
  0xa9   :  { %v101_v33 = vmul.f32 %v769_v31, %v100_v32 }
  0xab   :  { %v102_v34 = vmul.f32 0.5, %v101_v33  ;;  %v747_v33 = vld [vmem:[%s1019_s9 + $0x8] sm:$0xff] }
  0xac   :  { %371 = vmatpush.bf16.msra.mxu3 %v747_v33 }
  0xad   :  { %v103_v35 = vsub.f32 1.5, %v102_v34 }
  0xaf   :  { %v104_v37 = vmul.f32 %v769_v31, %v103_v35 }
  0xb1   :  { %v108_v38 = vsel %vm107_vm4, %v769_v31, %v104_v37 }
  0xb2   :  { %v109_v39 = vmul.f32 %v108_v38, %v97_v36  ;;  %v746_v38 = vld [vmem:[%s1019_s9] sm:$0xff] }
  0xb3   :  { %372 = vmatpush.bf16.msra.mxu3 %v746_v38 }
  0xb4   :  { %v114_v41 = vperm.slane %v109_v39, 0  ;;  %v111_v42 = vmul.f32 %v109_v39, %v86_v24  ;;  %v766_v39 = vld [vmem:[%s1017_s8] ss:$0 sm:$0xff] }
  0xb6   :  { %v112_v43 = vsub.f32 %v110_v40, %v111_v42  ;;  %v116_v44 = vmul.f32 %v114_v41, %v76_v6  ;;  %v743_v6 = vld [vmem:[%s1018_s7 + $0x8] sm:$0xff] }
  0xb7   :  { %293 = vmatpush.bf16.msrb.mxu0 %v743_v6 }
  0xb8   :  { %v118_v45 = vperm.slane %v112_v43, 0 }
  0xba   :  { %v120_v46 = vadd.f32 %v118_v45, %v116_v44 }
  0xbb   :  { %294 = vmatpush.bf16.msrb.mxu0 %v742_v10 }
  0xbc   :  { %v121_v47 = vmul.f32 0.2, %v120_v46 }
  0xbe   :  { %v122_v48 = vmax.f32 %v120_v46, %v121_v47 }
  0xc0   :  { %v123_v49 = vpack.c.bf16 %v122_v48, %v122_v48 }
  0xc2   :  { %196 = vmatmul.bf16.vlgmr.msra.gmra.mxu1 %v123_v49 }
 0x13f   :  { %v197_v50 = vpop.f32.mrf.mxu1 }
 0x140   :  { %v202_v51 = vsel %vm201_vm5, %v197_v50, 0.0  ;;  %v210_v52 = vmul.f32 %v197_v50, %v197_v50 }
 0x141   :  { %v203_v53 = vrot.slane %v202_v51, 4 }
 0x142   :  { %v211_v54 = vsel %vm201_vm5, %v210_v52, 0.0 }
 0x143   :  { %v204_v55 = vadd.f32 %v203_v53, %v202_v51  ;;  %v212_v56 = vrot.slane %v211_v54, 4  ;;  %v757_v53 = vld [vmem:[%s1022_s12 + $0x18] sm:$0xff] }
 0x144   :  { %463 = vmatpush.bf16.msra.mxu0 %v757_v53 }
 0x145   :  { %v205_v57 = vrot.slane %v204_v55, 2  ;;  %v213_v58 = vadd.f32 %v212_v56, %v211_v54 }
 0x147   :  { %v206_v60 = vadd.f32 %v205_v57, %v204_v55  ;;  %v214_v61 = vrot.slane %v213_v58, 2  ;;  %v199_v62 = vpop.f32.mrf.mxu1 }
 0x148   :  { %464 = vmatpush.bf16.msra.mxu0 %v756_v59  ;;  %v489_v59 = vld [vmem:[%s1027_s13] sm:$0x1] }
 0x149   :  { %v207_v63 = vrot.slane %v206_v60, 1  ;;  %v215_v0 = vadd.f32 %v214_v61, %v213_v58 }
 0x14b   :  { %v208_v2 = vadd.f32 %v207_v63, %v206_v60  ;;  %v216_v3 = vrot.slane %v215_v0, 1 }
 0x14d   :  { %v209_v4 = vmul.f32 0.125, %v208_v2  ;;  %v217_v5 = vadd.f32 %v216_v3, %v215_v0  ;;  %v755_v0 = vld [vmem:[%s1022_s12 + $0x8] sm:$0xff] }
 0x14e   :  { %465 = vmatpush.bf16.msra.mxu0 %v755_v0 }
 0x14f   :  { %v218_v7 = vmul.f32 0.125, %v217_v5  ;;  %v219_v8 = vmul.f32 %v209_v4, %v209_v4 }
 0x151   :  { %v220_v9 = vsub.f32 %v218_v7, %v219_v8 }
 0x153   :  { %v222_v11 = vadd.f32 1e-05, %v220_v9 }
 0x155   :  { %770 = vrsqrt.f32 %v222_v11  ;;  %vm229_vm7 = vweird.f32 %v222_v11 }
 0x15b   :  { %v771_v14 = vpop.eup %770 }
 0x15c   :  { %v224_v15 = vmul.f32 %v771_v14, %v222_v11  ;;  %vm230_vm6 = vweird.f32 %v771_v14  ;;  %v397_v11 = vld [vmem:[%s1023_s10] sm:$0x1] }
 0x15d   :  { %vm231_vm8 = vmor %vm229_vm7, %vm230_vm6 }
 0x15e   :  { %v225_v17 = vmul.f32 %v771_v14, %v224_v15  ;;  %v410_v15 = vld [vmem:[%s1024_s11] sm:$0x1] }
 0x160   :  { %v226_v18 = vmul.f32 0.5, %v225_v17 }
 0x162   :  { %v227_v20 = vsub.f32 1.5, %v226_v18 }
 0x164   :  { %v228_v22 = vmul.f32 %v771_v14, %v227_v20 }
 0x166   :  { %v232_v24 = vsel %vm231_vm8, %v771_v14, %v228_v22 }
 0x167   :  { %v233_v25 = vmul.f32 %v232_v24, %v221_v21 }
 0x169   :  { %v235_v27 = vmul.f32 %v233_v25, %v209_v4  ;;  %v238_v28 = vperm.slane %v233_v25, 0  ;;  %v754_v4 = vld [vmem:[%s1022_s12] sm:$0xff]  ;;  %v765_v25 = vld [vmem:[%s1026_s15 + $0x38] sm:$0xff] }
 0x16a   :  { %466 = vmatpush.bf16.msra.mxu0 %v754_v4  ;;  %584 = vmatpush.bf16.msra.mxu2 %v765_v25 }
 0x16b   :  { %v236_v30 = vsub.f32 %v234_v26, %v235_v27  ;;  %v240_v31 = vmul.f32 %v238_v28, %v197_v50  ;;  %v764_v26 = vld [vmem:[%s1026_s15 + $0x30] sm:$0xff]  ;;  %v763_v27 = vld [vmem:[%s1026_s15 + $0x28] sm:$0xff] }
 0x16d   :  { %v242_v32 = vperm.slane %v236_v30, 0 }
 0x16e   :  { %585 = vmatpush.bf16.msra.mxu2 %v764_v26 }
 0x16f   :  { %v244_v34 = vadd.f32 %v242_v32, %v240_v31  ;;  %v762_v31 = vld [vmem:[%s1026_s15 + $0x20] sm:$0xff] }
 0x171   :  { %v245_v35 = vmul.f32 0.2, %v244_v34 }
 0x172   :  { %586 = vmatpush.bf16.msra.mxu2 %v763_v27 }
 0x173   :  { %v246_v36 = vmax.f32 %v244_v34, %v245_v35 }
 0x175   :  { %v247_v37 = vpack.c.bf16 %v246_v36, %v246_v36  ;;  %v761_v36 = vld [vmem:[%s1026_s15 + $0x18] sm:$0xff] }
 0x176   :  { %587 = vmatpush.bf16.msra.mxu2 %v762_v31 }
 0x177   :  { %652 = vmatmul.msk.bf16.vlgmr.msrb.gmra.mxu0 %vm201_vm5, %v247_v37 }
 0x17a   :  { %588 = vmatpush.bf16.msra.mxu2 %v761_v36 }
 0x1f4   :  { %v296_v40 = vpop.f32.mrf.mxu0 }
 0x1f5   :  { %v950_v41 = vadd.f32 %v766_v39, %v296_v40 }
 0x1f7   :  { %v300_v42 = vpack.c.bf16 %v950_v41, %v950_v41 }
 0x1f9   :  { %373 = vmatmul.bf16.vlgmr.msra.gmra.mxu3 %v300_v42 }
 0x1fc   :  { %v298_v43 = vpop.f32.mrf.mxu0 }
 0x1fd   :  { %v760_v43 = vld [vmem:[%s1026_s15 + $0x10] sm:$0xff] }
 0x1fe   :  { %589 = vmatpush.bf16.msra.mxu2 %v760_v43 }
 0x27c   :  { %v374_v44 = vpop.f32.mrf.mxu3 }
 0x27d   :  { %v378_v45 = vsel %vm201_vm5, %v374_v44, 0.0  ;;  %v386_v46 = vmul.f32 %v374_v44, %v374_v44 }
 0x27e   :  { %v379_v47 = vrot.slane %v378_v45, 4 }
 0x27f   :  { %v387_v48 = vsel %vm201_vm5, %v386_v46, 0.0  ;;  %v759_v46 = vld [vmem:[%s1026_s15 + $0x8] sm:$0xff] }
 0x280   :  { %v380_v49 = vadd.f32 %v379_v47, %v378_v45  ;;  %v388_v50 = vrot.slane %v387_v48, 4  ;;  %590 = vmatpush.bf16.msra.mxu2 %v759_v46 }
 0x282   :  { %v381_v51 = vrot.slane %v380_v49, 2  ;;  %v389_v52 = vadd.f32 %v388_v50, %v387_v48 }
 0x284   :  { %v382_v54 = vadd.f32 %v381_v51, %v380_v49  ;;  %v390_v55 = vrot.slane %v389_v52, 2  ;;  %v376_v56 = vpop.f32.mrf.mxu3  ;;  %v758_v51 = vld [vmem:[%s1026_s15] sm:$0xff] }
 0x285   :  { %591 = vmatpush.bf16.msra.mxu2 %v758_v51 }
 0x286   :  { %v383_v57 = vrot.slane %v382_v54, 1  ;;  %v391_v58 = vadd.f32 %v390_v55, %v389_v52 }
 0x288   :  { %v384_v60 = vadd.f32 %v383_v57, %v382_v54  ;;  %v392_v61 = vrot.slane %v391_v58, 1 }
 0x28a   :  { %v385_v62 = vmul.f32 0.125, %v384_v60  ;;  %v393_v63 = vadd.f32 %v392_v61, %v391_v58 }
 0x28c   :  { %v394_v1 = vmul.f32 0.125, %v393_v63  ;;  %v395_v2 = vmul.f32 %v385_v62, %v385_v62  ;;  %v502_v63 = vld [vmem:[%s1028_s14] sm:$0x1] }
 0x28e   :  { %v396_v3 = vsub.f32 %v394_v1, %v395_v2 }
 0x290   :  { %v398_v5 = vadd.f32 1e-05, %v396_v3 }
 0x292   :  { %772 = vrsqrt.f32 %v398_v5  ;;  %vm405_vm10 = vweird.f32 %v398_v5 }
 0x298   :  { %v773_v6 = vpop.eup %772 }
 0x299   :  { %v400_v7 = vmul.f32 %v773_v6, %v398_v5  ;;  %vm406_vm9 = vweird.f32 %v773_v6 }
 0x29a   :  { %vm407_vm11 = vmor %vm405_vm10, %vm406_vm9 }
 0x29b   :  { %v401_v8 = vmul.f32 %v773_v6, %v400_v7 }
 0x29d   :  { %v402_v9 = vmul.f32 0.5, %v401_v8 }
 0x29f   :  { %v403_v10 = vsub.f32 1.5, %v402_v9  ;;  %v767_v9 = vld [vmem:[%s1025_s16] ss:$0 sm:$0xff] }
 0x2a1   :  { %v404_v12 = vmul.f32 %v773_v6, %v403_v10 }
 0x2a3   :  { %v408_v13 = vsel %vm407_vm11, %v773_v6, %v404_v12 }
 0x2a4   :  { %v409_v14 = vmul.f32 %v408_v13, %v397_v11 }
 0x2a6   :  { %v411_v16 = vmul.f32 %v409_v14, %v385_v62  ;;  %v414_v17 = vperm.slane %v409_v14, 0 }
 0x2a8   :  { %v412_v18 = vsub.f32 %v410_v15, %v411_v16  ;;  %v416_v19 = vmul.f32 %v414_v17, %v374_v44 }
 0x2aa   :  { %v418_v20 = vperm.slane %v412_v18, 0 }
 0x2ac   :  { %v420_v21 = vadd.f32 %v418_v20, %v416_v19 }
 0x2ae   :  { %v421_v22 = vmul.f32 0.2, %v420_v21 }
 0x2b0   :  { %v422_v23 = vmax.f32 %v420_v21, %v421_v22 }
 0x2b2   :  { %v423_v24 = vpack.c.bf16 %v422_v23, %v422_v23 }
 0x2b4   :  { %701 = vmatmul.msk.bf16.vlgmr.msra.gmra.mxu0 %vm201_vm5, %v423_v24 }
 0x331   :  { %v468_v28 = vpop.f32.mrf.mxu0 }
 0x332   :  { %v472_v29 = vrot.slane %v468_v28, 4  ;;  %v479_v30 = vmul.f32 %v468_v28, %v468_v28 }
 0x334   :  { %v473_v32 = vadd.f32 %v472_v29, %v468_v28  ;;  %v480_v33 = vrot.slane %v479_v30, 4 }
 0x336   :  { %v474_v34 = vrot.slane %v473_v32, 2  ;;  %v481_v35 = vadd.f32 %v480_v33, %v479_v30 }
 0x338   :  { %v475_v37 = vadd.f32 %v474_v34, %v473_v32  ;;  %v482_v38 = vrot.slane %v481_v35, 2 }
 0x339   :  { %v470_v39 = vpop.f32.mrf.mxu0 }
 0x33a   :  { %v476_v40 = vrot.slane %v475_v37, 1  ;;  %v483_v42 = vadd.f32 %v482_v38, %v481_v35 }
 0x33c   :  { %v477_v44 = vadd.f32 %v476_v40, %v475_v37  ;;  %v484_v45 = vrot.slane %v483_v42, 1 }
 0x33e   :  { %v478_v47 = vmul.f32 0.125, %v477_v44  ;;  %v485_v48 = vadd.f32 %v484_v45, %v483_v42 }
 0x340   :  { %v486_v49 = vmul.f32 0.125, %v485_v48  ;;  %v487_v50 = vmul.f32 %v478_v47, %v478_v47 }
 0x342   :  { %v488_v52 = vsub.f32 %v486_v49, %v487_v50 }
 0x344   :  { %v490_v53 = vadd.f32 1e-05, %v488_v52 }
 0x346   :  { %774 = vrsqrt.f32 %v490_v53  ;;  %vm497_vm13 = vweird.f32 %v490_v53 }
 0x34c   :  { %v775_v54 = vpop.eup %774 }
 0x34d   :  { %v492_v55 = vmul.f32 %v775_v54, %v490_v53  ;;  %vm498_vm12 = vweird.f32 %v775_v54 }
 0x34e   :  { %vm499_vm14 = vmor %vm497_vm13, %vm498_vm12 }
 0x34f   :  { %v493_v56 = vmul.f32 %v775_v54, %v492_v55 }
 0x351   :  { %v494_v57 = vmul.f32 0.5, %v493_v56 }
 0x353   :  { %v495_v58 = vsub.f32 1.5, %v494_v57 }
 0x355   :  { %v496_v60 = vmul.f32 %v775_v54, %v495_v58 }
 0x357   :  { %v500_v61 = vsel %vm499_vm14, %v775_v54, %v496_v60 }
 0x358   :  { %v501_v62 = vmul.f32 %v500_v61, %v489_v59 }
 0x35a   :  { %v506_v0 = vperm.slane %v501_v62, 0  ;;  %v503_v1 = vmul.f32 %v501_v62, %v478_v47 }
 0x35c   :  { %v504_v2 = vsub.f32 %v502_v63, %v503_v1  ;;  %v508_v3 = vmul.f32 %v506_v0, %v468_v28 }
 0x35e   :  { %v510_v4 = vperm.slane %v504_v2, 0 }
 0x360   :  { %v512_v5 = vadd.f32 %v510_v4, %v508_v3 }
 0x362   :  { %v513_v6 = vmul.f32 0.2, %v512_v5 }
 0x364   :  { %v514_v7 = vmax.f32 %v512_v5, %v513_v6 }
 0x366   :  { %v515_v8 = vpack.c.bf16 %v514_v7, %v514_v7 }
 0x368   :  { %592 = vmatmul.bf16.vlgmr.msra.gmra.mxu2 %v515_v8 }
 0x3eb   :  { %v593_v10 = vpop.f32.mrf.mxu2 }
 0x3ec   :  { %v594_v11 = vadd.f32 %v767_v9, %v593_v10 }
 0x3ee   :  { %v597_v12 = vadd.f32 %v594_v11, %v950_v41 }
 0x3f0   :  { %598 = vst [vmem:[%s1029_s17] sm:$0xff] %v597_v12 }
 0x3f3   :  { %v595_v13 = vpop.f32.mrf.mxu2 }

</bundles_post_ra>
